<compile_context>
chip_gen: v5e
topology: v5e:2x2
jax: 0.10.0
libtpu: 0.0.40
codegen_flags: <defaults>
</compile_context>

<pallas_src>
import functools

import jax
import jax.numpy as jnp
from jax import lax
from jax.experimental import pallas as pl
from jax.experimental.pallas import tpu as pltpu

LANES = 128
SUBLANES = 8
MAX_BLOCK_ROWS = 8192                 # (8192,128) f32 = 4 MiB per block per input.
VMEM_LIMIT_BYTES = 48 * 1024 * 1024   # 2 inputs x 2 buffers x 4 MiB + temps << 48 MiB.


def _round_up(v: int, m: int) -> int:
    return ((v + m - 1) // m) * m


def _cdiv(a: int, b: int) -> int:
    return (a + b - 1) // b


def _sublane_multiple(dtype) -> int:
    # Native sublane tile: 8 rows for 32-bit, 16 for bf16/f16, 32 for 8-bit.
    itemsize = max(1, jnp.dtype(dtype).itemsize)
    return SUBLANES * max(1, 4 // itemsize)


def _num_tensorcores() -> int:
    # Best-effort detection of TensorCores per chip (2 on v7x, 1 on v5e/v6e).
    try:
        info = pltpu.get_tpu_info()
    except Exception:
        return 1
    for attr in ("num_cores", "core_count", "num_tensorcores",
                 "tensorcore_count", "cores_per_chip", "num_tensor_cores"):
        v = getattr(info, attr, None)
        if isinstance(v, int) and v >= 1:
            return v
    return 1


def _mse_kernel(x_ref, y_ref, o_ref, *, rows, block_rows, nb, bpc, needs_mask):
    c = pl.program_id(0)  # chunk (one per TensorCore when CORE_PARALLEL)
    s = pl.program_id(1)  # sequential reduction step within the chunk

    # Output block index depends only on c -> resident across the whole s loop;
    # use it directly as the accumulator.
    @pl.when(s == 0)
    def _():
        o_ref[...] = jnp.zeros_like(o_ref)

    d = x_ref[...].astype(jnp.float32) - y_ref[...].astype(jnp.float32)
    sq = d * d

    def fold(v):
        # Fold (block_rows, 128) onto the vreg-shaped (8, 128) accumulator:
        # pure VPU elementwise adds, no per-step cross-lane reduce.
        return v.reshape(block_rows // SUBLANES, SUBLANES, LANES).sum(axis=0)

    if needs_mask:
        blk = c * bpc + s  # logical (unclamped) block index

        # Only the final logical block (and clamped over-coverage duplicates,
        # which compare as blk >= nb) pays for the mask; interior blocks take
        # the unmasked, memory-bound path.
        @pl.when(blk >= nb - 1)
        def _():
            # Block-local row compare: rem <= 0 zeroes duplicate blocks fully.
            # NOTE: relies on jnp.where discarding whatever garbage Pallas
            # left in the out-of-range rows of a partial block (it is a
            # select, so NaN/Inf garbage is fine).
            rem = rows - blk * block_rows
            row = lax.broadcasted_iota(jnp.int32, sq.shape, 0)
            o_ref[...] += fold(jnp.where(row < rem, sq, 0.0))

        @pl.when(blk < nb - 1)
        def _():
            o_ref[...] += fold(sq)
    else:
        o_ref[...] += fold(sq)


def mse_loss(outputs: jax.Array, targets: jax.Array) -> jax.Array:
    """Equivalent of F.mse_loss(outputs.view(-1), targets) (mean reduction)."""
    x = outputs.reshape(-1)
    y = targets.reshape(-1)
    assert x.size == y.size, "outputs and targets must have the same numel"
    n = x.size
    assert n > 0

    # Lane alignment. The reshape below is free (no copy) when n % 128 == 0.
    # TODO(synk): for n % 128 != 0 this pad materializes a copy of both inputs;
    # a zero-copy version would reduce the <=127-element tail in the wrapper.
    padded = _round_up(n, LANES)
    if padded != n:
        x = jnp.pad(x, (0, padded - n))  # zero pad -> (0-0)^2 contributes 0
        y = jnp.pad(y, (0, padded - n))
    rows = padded // LANES
    x2 = x.reshape(rows, LANES)
    y2 = y.reshape(rows, LANES)

    # Large blocks to amortize per-grid-step overhead; rounded to the
    # dtype-native sublane tile so packed layouts stay native.
    sub_mult = max(_sublane_multiple(x2.dtype), _sublane_multiple(y2.dtype))
    block_rows = min(MAX_BLOCK_ROWS, _round_up(rows, sub_mult))
    nb = _cdiv(rows, block_rows)  # total row-blocks

    # 2-way split only when the chip really has 2 TensorCores (v7x); single-TC
    # chips (v5e/v6e) keep a single stream (no redundant clamped block).
    ncores = _num_tensorcores()
    nchunks = 2 if (ncores >= 2 and nb >= 2) else 1
    bpc = _cdiv(nb, nchunks)  # blocks per chunk

    needs_mask = (nb * block_rows != rows) or (nchunks * bpc != nb)

    kernel = functools.partial(
        _mse_kernel,
        rows=rows,
        block_rows=block_rows,
        nb=nb,
        bpc=bpc,
        needs_mask=needs_mask,
    )

    def in_map(c, s):
        # Clamp so over-coverage blocks re-read the last valid block
        # (their contribution is masked to zero in the kernel).
        return (jnp.minimum(c * bpc + s, nb - 1), 0)

    if nchunks > 1:
        dim_sem = (pltpu.CORE_PARALLEL, pltpu.ARBITRARY)
    else:
        dim_sem = (pltpu.ARBITRARY, pltpu.ARBITRARY)

    partials = pl.pallas_call(
        kernel,
        out_shape=jax.ShapeDtypeStruct((nchunks * SUBLANES, LANES), jnp.float32),
        grid_spec=pltpu.PrefetchScalarGridSpec(
            num_scalar_prefetch=0,
            grid=(nchunks, bpc),
            in_specs=[
                pl.BlockSpec((block_rows, LANES), in_map),
                pl.BlockSpec((block_rows, LANES), in_map),
            ],
            out_specs=pl.BlockSpec((SUBLANES, LANES), lambda c, s: (c, 0)),
        ),
        compiler_params=pltpu.CompilerParams(
            dimension_semantics=dim_sem,
            vmem_limit_bytes=VMEM_LIMIT_BYTES,
        ),
    )(x2, y2)

    # Single cross-lane reduce on a tiny array + the 1/N mean, outside the kernel.
    return jnp.sum(partials) * (1.0 / n)


if __name__ == "__main__":
    key = jax.random.PRNGKey(0)
    k1, k2 = jax.random.split(key)

    # PyTorch-style NCHW outputs; the forward flattens outputs to 1-D.
    outputs = jax.random.normal(k1, (2, 4, 16, 16), dtype=jnp.float32)
    targets = jax.random.normal(k2, (2 * 4 * 16 * 16,), dtype=jnp.float32)

    loss = mse_loss(outputs, targets)
    jax.block_until_ready(loss)

    # Reference check against plain JAX.
    ref = jnp.mean((outputs.reshape(-1) - targets) ** 2)
    assert jnp.allclose(loss, ref, rtol=1e-5, atol=1e-6), (loss, ref)

    print("KERNEL_OK")
</pallas_src>

<mosaic_0001>
module attributes {stable_mosaic.version = 11 : i64} {
  func.func @_mse_kernel(%arg0: i32, %arg1: i32, %arg2: memref<16x128xf32, #tpu.memory_space<vmem>>, %arg3: memref<16x128xf32, #tpu.memory_space<vmem>>, %arg4: memref<8x128xf32, #tpu.memory_space<vmem>>) attributes {dimension_semantics = [#tpu.dimension_semantics<arbitrary>, #tpu.dimension_semantics<arbitrary>], iteration_bounds = array<i64: 1, 1>, scalar_prefetch = 0 : i64, scratch_operands = 0 : i64, tpu.core_type = #tpu.core_type<tc>, window_params = [{transform_indices = @transform_0, window_bounds = array<i64: 16, 128>}, {transform_indices = @transform_1, window_bounds = array<i64: 16, 128>}, {transform_indices = @transform_2, window_bounds = array<i64: 8, 128>}]} {
    %c0_i32 = arith.constant 0 : i32
    %0 = arith.cmpi eq, %arg1, %c0_i32 : i32
    %1 = arith.extui %0 : i1 to i32
    %c0_i32_0 = arith.constant 0 : i32
    %2 = arith.cmpi ne, %1, %c0_i32_0 : i32
    scf.if %2 {
      %cst_8 = arith.constant 0.000000e+00 : f32
      %12 = vector.broadcast %cst_8 : f32 to vector<8x128xf32>
      %c0_9 = arith.constant 0 : index
      %c0_10 = arith.constant 0 : index
      %13 = vector.load %arg4[%c0_9, %c0_10] : memref<8x128xf32, #tpu.memory_space<vmem>>, vector<8x128xf32>
      tpu.vector_store %arg4[%c0_9, %c0_10], %12 {strides = array<i32>} : memref<8x128xf32, #tpu.memory_space<vmem>>, vector<8x128xf32>,
    } else {
    }
    %c0 = arith.constant 0 : index
    %c0_1 = arith.constant 0 : index
    %3 = vector.load %arg2[%c0, %c0_1] : memref<16x128xf32, #tpu.memory_space<vmem>>, vector<16x128xf32>
    %c0_2 = arith.constant 0 : index
    %c0_3 = arith.constant 0 : index
    %4 = vector.load %arg3[%c0_2, %c0_3] : memref<16x128xf32, #tpu.memory_space<vmem>>, vector<16x128xf32>
    %5 = arith.subf %3, %4 : vector<16x128xf32>
    %6 = arith.mulf %5, %5 : vector<16x128xf32>
    %c0_4 = arith.constant 0 : index
    %c0_5 = arith.constant 0 : index
    %7 = vector.load %arg4[%c0_4, %c0_5] : memref<8x128xf32, #tpu.memory_space<vmem>>, vector<8x128xf32>
    %8 = vector.shape_cast %6 : vector<16x128xf32> to vector<2x8x128xf32>
    %cst = arith.constant dense<0.000000e+00> : vector<8x128xf32>
    %9 = vector.multi_reduction <add>, %8, %cst [0] : vector<2x8x128xf32> to vector<8x128xf32>
    %10 = arith.addf %7, %9 : vector<8x128xf32>
    %c0_6 = arith.constant 0 : index
    %c0_7 = arith.constant 0 : index
    %11 = vector.load %arg4[%c0_6, %c0_7] : memref<8x128xf32, #tpu.memory_space<vmem>>, vector<8x128xf32>
    tpu.vector_store %arg4[%c0_6, %c0_7], %10 {strides = array<i32>} : memref<8x128xf32, #tpu.memory_space<vmem>>, vector<8x128xf32>,
    return
  }
  func.func @transform_0(%arg0: i32, %arg1: i32) -> (i32, i32) {
    %c1_i32 = arith.constant 1 : i32
    %0 = arith.muli %arg0, %c1_i32 : i32
    %1 = arith.addi %0, %arg1 : i32
    %c0_i32 = arith.constant 0 : i32
    %2 = arith.minsi %1, %c0_i32 : i32
    %c0_i32_0 = arith.constant 0 : i32
    %c0_i32_1 = arith.constant 0 : i32
    return %2, %c0_i32_0 : i32, i32
  }
  func.func @transform_1(%arg0: i32, %arg1: i32) -> (i32, i32) {
    %c1_i32 = arith.constant 1 : i32
    %0 = arith.muli %arg0, %c1_i32 : i32
    %1 = arith.addi %0, %arg1 : i32
    %c0_i32 = arith.constant 0 : i32
    %2 = arith.minsi %1, %c0_i32 : i32
    %c0_i32_0 = arith.constant 0 : i32
    %c0_i32_1 = arith.constant 0 : i32
    return %2, %c0_i32_0 : i32, i32
  }
  func.func @transform_2(%arg0: i32, %arg1: i32) -> (i32, i32) {
    %c0_i32 = arith.constant 0 : i32
    %c0_i32_0 = arith.constant 0 : i32
    return %arg0, %c0_i32 : i32, i32
  }
}

</mosaic_0001>

<bundles_post_ra>
// kernel: tpu_custom_call.1
= control target key start
LH: loop header
LB: loop body
LE: loop exit
PB: predicated region body
PF: predicated region fallthrough
CT: control target
= control target key end

     0   :  { %7 = vsyncpa [#allocation3], 0  ;;  %s216_s0 = inlined_call_operand.hbm [shape: f32[16,128], index: 0, kind: input, shape index: {}]   ;;  %s217_s1 = inlined_call_operand.hbm [shape: f32[16,128], index: 1, kind: input, shape index: {}]   ;;  %s218_s2 = inlined_call_operand.hbm [shape: f32[8,128], index: 2, kind: output, shape index: {}]  }
   0x1   :  { %8 = vsyncpa [#allocation6], 0 }
   0x2   :  { %9 = vsyncpa [#allocation4], 0  ;;  %s20_s11 = sshll.u32 %s216_s0, 4  ;;  %s187_s12 = smov [#allocation2]   ;;  %s21_s11 = int_to_ptr.hbm [resolvable:$true] %s20_s11 }
   0x3   :  { %s22_s13 = sshll.u32 %s187_s12, 4  ;;  %s39_s16 = sshll.u32 %s217_s1, 4  ;;  %s23_s13 = int_to_ptr.vmem [resolvable:$true] %s22_s13  ;;  %s40_s16 = int_to_ptr.hbm [resolvable:$true] %s39_s16 }
   0x4   :  { %s188_s17 = smov 128   ;;  %s189_s18 = smov 8  }
   0x5   :  { %28 = dma.hbm_to_vmem [thread:$0]  %s21_s11, 256, %s23_s13, [#allocation3], %s188_s17, %s188_s17, %s189_s18  }
   0x6   :  { %s190_s19 = smov [#allocation5]  }
   0x7   :  { %s41_s20 = sshll.u32 %s190_s19, 4  ;;  %s42_s20 = int_to_ptr.vmem [resolvable:$true] %s41_s20 }
   0x8   :  { %47 = dma.hbm_to_vmem [thread:$0]  %s40_s16, 256, %s42_s20, [#allocation6], %s188_s17, %s188_s17, %s189_s18  }
   0x9   :  { %181 = dma.done.wait [#allocation3], 256  }
   0xa   :  { %182 = vsyncadd [#allocation3], 4294967040 }
   0xb   :  { %183 = dma.done.wait [#allocation6], 256  }
   0xc   :  { %184 = vsyncadd [#allocation6], 4294967040  ;;  %v69_v0 = vld [vmem:[#allocation2] sm:$0xff]  ;;  %v70_v1 = vld [vmem:[#allocation2 + $0x8] sm:$0xff]  ;;  %s191_s0 = smov [#allocation7]   ;;  %s88_s23 = sshll.u32 %s218_s2, 4  ;;  %s89_s23 = int_to_ptr.hbm [resolvable:$true] %s88_s23 }
   0xd   :  { %v71_v2 = vld [vmem:[#allocation5] sm:$0xff]  ;;  %v72_v3 = vld [vmem:[#allocation5 + $0x8] sm:$0xff]  ;;  %s86_s1 = sshll.u32 %s191_s0, 4  ;;  %s87_s1 = int_to_ptr.vmem [resolvable:$true] %s86_s1 }
   0xe   :  { %v73_v4 = vsub.f32 %v69_v0, %v71_v2  ;;  %v74_v5 = vsub.f32 %v70_v1, %v72_v3 }
  0x10   :  { %v75_v6 = vmul.f32 %v73_v4, %v73_v4  ;;  %v76_v7 = vmul.f32 %v74_v5, %v74_v5 }
  0x12   :  { %v78_v8 = vadd.f32 %v76_v7, %v75_v6 }
  0x14   :  { %80 = vst [vmem:[#allocation7] sm:$0xff] %v78_v8 }
  0x15   :  { %91 = dma.vmem_to_hbm [thread:$0]  %s87_s1, 128, %s89_s23, [#allocation4]  }
  0x16   :  { %185 = dma.done.wait [#allocation4], 128  }
  0x17   :  { %186 = vsyncadd [#allocation4], 4294967168 }
  0x18   :  { %96 = vsyncpa [#allocation3], 1 }
  0x19   :  { %97 = vsyncpa [#allocation6], 1 }
  0x1a   :  { %98 = vsyncpa [#allocation4], 1 }

</bundles_post_ra>
